<compile_context>
chip_gen: v6e
topology: v6e:2x2x1
jax: 0.10.0
libtpu: 0.0.40
codegen_flags: <defaults>
</compile_context>

<pallas_src>
import jax
import jax.numpy as jnp
from jax import lax
from jax.experimental import pallas as pl

# ---------------- model dims (small, consistent with the forward) ----------
B       = 2    # batch
SEQ_LEN = 8    # encoder sequence length
PRED    = 4    # prediction length
LABEL   = 4    # label length (x_dec = label + pred steps)
ENC_IN  = 4    # encoder input channels
DEC_IN  = 4    # decoder input channels
MARK    = 3    # time-mark features
D_MODEL = 32
D_FF    = 64
C_OUT   = 4
DEC_LEN = LABEL + PRED
IN_PAD  = 8            # ENC_IN + MARK (= DEC_IN + MARK) padded to 8 channels
BL      = B * SEQ_LEN  # batch folded onto sublanes (16 encoder rows)
BP      = B * PRED     # 8 decoder/forecast rows
SCALE   = 1.0 / (float(D_MODEL) ** 0.5)

# ------------- single packed parameter slab (rows are 8-aligned) -----------
ROW_ATTN   = 0                       # [D_MODEL, 4*D_MODEL] = [32,128] wq*SCALE|wk|wv|wo
ROW_EMBCAT = ROW_ATTN + D_MODEL      # [2*IN_PAD, D_MODEL]   enc emb (rows 0:8) | dec emb (rows 8:16)
ROW_W1     = ROW_EMBCAT + 2 * IN_PAD # [D_MODEL, D_FF]
ROW_W2     = ROW_W1 + D_MODEL        # [D_FF, D_MODEL]
ROW_TIME   = ROW_W2 + D_FF           # [BP, BL]              block-diag temporal proj
ROW_OUT    = ROW_TIME + BP           # [D_MODEL, 128]        w_out, lane-padded (cols 0:C_OUT)
ROW_MASK   = ROW_OUT + D_MODEL       # [BL, BL]              additive attn mask (0 / -1e9)
ROW_B_EMB  = ROW_MASK + BL           # bias rows follow, one per row
ROW_B_DEC  = ROW_B_EMB + 1
ROW_G1     = ROW_B_DEC + 1
ROW_BE1    = ROW_G1 + 1
ROW_BF1    = ROW_BE1 + 1
ROW_BF2    = ROW_BF1 + 1
ROW_G2     = ROW_BF2 + 1
ROW_BE2    = ROW_G2 + 1
ROW_B_OUT  = ROW_BE2 + 1             # lane-padded (lanes 0:C_OUT)
W_ROWS     = 216                     # padded to a multiple of 8 (>= ROW_B_OUT + 1)
W_COLS     = 128


def _layernorm(x, gamma, beta, eps=1e-5):
    mu = jnp.mean(x, axis=-1, keepdims=True)
    var = jnp.mean((x - mu) ** 2, axis=-1, keepdims=True)
    return (x - mu) * lax.rsqrt(var + eps) * gamma + beta


def backbone_kernel(xa_ref, w_ref, out_ref):
    f32 = jnp.float32

    xa = xa_ref[...]                                                 # [BL+BP, 2*IN_PAD]

    # ---- static slices of the single packed parameter slab -----------------
    w_qkvo   = w_ref[ROW_ATTN:ROW_ATTN + D_MODEL, :]                 # [32,128]
    w_embcat = w_ref[ROW_EMBCAT:ROW_EMBCAT + 2 * IN_PAD, 0:D_MODEL]  # [16,32]
    w1       = w_ref[ROW_W1:ROW_W1 + D_MODEL, 0:D_FF]                # [32,64]
    w2       = w_ref[ROW_W2:ROW_W2 + D_FF, 0:D_MODEL]                # [64,32]
    w_time   = w_ref[ROW_TIME:ROW_TIME + BP, 0:BL]                   # [8,16]
    w_out    = w_ref[ROW_OUT:ROW_OUT + D_MODEL, :]                   # [32,128] (lanes >=C_OUT zero)
    amask    = w_ref[ROW_MASK:ROW_MASK + BL, 0:BL]                   # [16,16]  additive 0/-1e9

    b_emb = w_ref[ROW_B_EMB:ROW_B_EMB + 1, 0:D_MODEL]
    b_dec = w_ref[ROW_B_DEC:ROW_B_DEC + 1, 0:D_MODEL]
    g1    = w_ref[ROW_G1:ROW_G1 + 1, 0:D_MODEL]
    be1   = w_ref[ROW_BE1:ROW_BE1 + 1, 0:D_MODEL]
    bf1   = w_ref[ROW_BF1:ROW_BF1 + 1, 0:D_FF]
    bf2   = w_ref[ROW_BF2:ROW_BF2 + 1, 0:D_MODEL]
    g2    = w_ref[ROW_G2:ROW_G2 + 1, 0:D_MODEL]
    be2   = w_ref[ROW_BE2:ROW_BE2 + 1, 0:D_MODEL]
    b_out = w_ref[ROW_B_OUT:ROW_B_OUT + 1, :]                        # [1,128]

    # ---- fused enc + dec embedding: ONE matmul via block-diagonal layout ---
    emb = jnp.dot(xa, w_embcat, preferred_element_type=f32)          # [BL+BP, D]
    enc = emb[0:BL, :] + b_emb                                       # [BL, D]
    dec = emb[BL:BL + BP, :] + b_dec                                 # [BP, D]

    # ---- single-head self-attention, batch folded onto sublanes -----------
    qkvo = jnp.dot(enc, w_qkvo, preferred_element_type=f32)          # [BL, 4D]
    q = qkvo[:, 0:D_MODEL]                                           # already scaled by 1/sqrt(D)
    k = qkvo[:, D_MODEL:2 * D_MODEL]
    v = qkvo[:, 2 * D_MODEL:3 * D_MODEL]
    wo = w_qkvo[:, 3 * D_MODEL:4 * D_MODEL]                          # [D, D]

    # contract last dims of q and k directly (no explicit transpose);
    # add the precomputed block-diagonal mask (keeps attention per-batch).
    scores = lax.dot_general(q, k, (((1,), (1,)), ((), ())),
                             preferred_element_type=f32) + amask     # [BL, BL]

    scores = scores - jnp.max(scores, axis=-1, keepdims=True)        # keep for overflow safety
    p = jnp.exp(scores)
    attn = p / jnp.sum(p, axis=-1, keepdims=True)                    # exact division
    ctx = jnp.dot(attn, v, preferred_element_type=f32)               # [BL, D]
    att_out = jnp.dot(ctx, wo, preferred_element_type=f32)

    h = _layernorm(enc + att_out, g1, be1)

    # ---- feed-forward ------------------------------------------------------
    ff = jnp.maximum(jnp.dot(h, w1, preferred_element_type=f32) + bf1, 0.0)
    ff = jnp.dot(ff, w2, preferred_element_type=f32) + bf2
    enc_out = _layernorm(h + ff, g2, be2)                            # [BL, D]

    # ---- temporal projection (block-diag over batch) + lane-dense head ----
    y = jnp.dot(w_time, enc_out, preferred_element_type=f32) + dec   # [BP, D]
    out = jnp.dot(y, w_out, preferred_element_type=f32) + b_out      # [BP, 128]
    out_ref[...] = out.astype(out_ref.dtype)                         # one unmasked vst


def init_params(key):
    """Deterministic parameter init (synthetic backbone weights)."""
    ks = jax.random.split(key, 24)
    s = lambda n: 1.0 / jnp.sqrt(jnp.float32(n))
    p = {
        "w_emb":      jax.random.normal(ks[0], (ENC_IN, D_MODEL)) * s(ENC_IN),
        "w_mark":     jax.random.normal(ks[1], (MARK, D_MODEL)) * s(MARK),
        "b_emb":      0.1 * jax.random.normal(ks[12], (D_MODEL,)),
        "wq":         jax.random.normal(ks[2], (D_MODEL, D_MODEL)) * s(D_MODEL),
        "wk":         jax.random.normal(ks[3], (D_MODEL, D_MODEL)) * s(D_MODEL),
        "wv":         jax.random.normal(ks[4], (D_MODEL, D_MODEL)) * s(D_MODEL),
        "wo":         jax.random.normal(ks[5], (D_MODEL, D_MODEL)) * s(D_MODEL),
        "g1":         1.0 + 0.1 * jax.random.normal(ks[13], (D_MODEL,)),
        "be1":        0.1 * jax.random.normal(ks[14], (D_MODEL,)),
        "w1":         jax.random.normal(ks[6], (D_MODEL, D_FF)) * s(D_MODEL),
        "bf1":        0.1 * jax.random.normal(ks[15], (D_FF,)),
        "w2":         jax.random.normal(ks[7], (D_FF, D_MODEL)) * s(D_FF),
        "bf2":        0.1 * jax.random.normal(ks[16], (D_MODEL,)),
        "g2":         1.0 + 0.1 * jax.random.normal(ks[17], (D_MODEL,)),
        "be2":        0.1 * jax.random.normal(ks[18], (D_MODEL,)),
        "w_dec":      jax.random.normal(ks[8], (DEC_IN, D_MODEL)) * s(DEC_IN),
        "w_mark_dec": jax.random.normal(ks[9], (MARK, D_MODEL)) * s(MARK),
        "b_dec":      0.1 * jax.random.normal(ks[19], (D_MODEL,)),
        "w_time":     jax.random.normal(ks[10], (PRED, SEQ_LEN)) * s(SEQ_LEN),
        "w_out":      jax.random.normal(ks[11], (D_MODEL, C_OUT)) * s(D_MODEL),
        "b_out":      0.1 * jax.random.normal(ks[20], (C_OUT,)),
    }
    return {k: v.astype(jnp.float32) for k, v in p.items()}


def pack_params(p):
    """Pack ALL weights / mask / biases into one lane-dense slab (off-path)."""
    w = jnp.zeros((W_ROWS, W_COLS), jnp.float32)
    # fused attention weights: wq*SCALE | wk | wv | wo  (scale folded in)
    w = w.at[ROW_ATTN:ROW_ATTN + D_MODEL, 0:D_MODEL].set(p["wq"] * SCALE)
    w = w.at[ROW_ATTN:ROW_ATTN + D_MODEL, D_MODEL:2 * D_MODEL].set(p["wk"])
    w = w.at[ROW_ATTN:ROW_ATTN + D_MODEL, 2 * D_MODEL:3 * D_MODEL].set(p["wv"])
    w = w.at[ROW_ATTN:ROW_ATTN + D_MODEL, 3 * D_MODEL:4 * D_MODEL].set(p["wo"])
    # stacked (enc | dec) embeddings: rows 0:8 enc (value|mark|0), rows 8:16 dec
    w = w.at[ROW_EMBCAT:ROW_EMBCAT + ENC_IN, 0:D_MODEL].set(p["w_emb"])
    w = w.at[ROW_EMBCAT + ENC_IN:ROW_EMBCAT + ENC_IN + MARK, 0:D_MODEL].set(p["w_mark"])
    w = w.at[ROW_EMBCAT + IN_PAD:ROW_EMBCAT + IN_PAD + DEC_IN, 0:D_MODEL].set(p["w_dec"])
    w = w.at[ROW_EMBCAT + IN_PAD + DEC_IN:ROW_EMBCAT + IN_PAD + DEC_IN + MARK,
             0:D_MODEL].set(p["w_mark_dec"])
    # feed-forward
    w = w.at[ROW_W1:ROW_W1 + D_MODEL, 0:D_FF].set(p["w1"])
    w = w.at[ROW_W2:ROW_W2 + D_FF, 0:D_MODEL].set(p["w2"])
    # block-diagonal temporal projection (batch folded onto sublanes)
    for b in range(B):
        w = w.at[ROW_TIME + b * PRED:ROW_TIME + (b + 1) * PRED,
                 b * SEQ_LEN:(b + 1) * SEQ_LEN].set(p["w_time"])
    # output head, lane-padded to 128 (only cols 0:C_OUT non-zero)
    w = w.at[ROW_OUT:ROW_OUT + D_MODEL, 0:C_OUT].set(p["w_out"])
    # precomputed additive block-diagonal attention mask (0 within batch, -1e9 across)
    rowb = jnp.arange(BL)[:, None] // SEQ_LEN
    colb = jnp.arange(BL)[None, :] // SEQ_LEN
    amask = jnp.where(rowb == colb, 0.0, -1e9).astype(jnp.float32)
    w = w.at[ROW_MASK:ROW_MASK + BL, 0:BL].set(amask)
    # bias / scale rows
    w = w.at[ROW_B_EMB, 0:D_MODEL].set(p["b_emb"])
    w = w.at[ROW_B_DEC, 0:D_MODEL].set(p["b_dec"])
    w = w.at[ROW_G1, 0:D_MODEL].set(p["g1"])
    w = w.at[ROW_BE1, 0:D_MODEL].set(p["be1"])
    w = w.at[ROW_BF1, 0:D_FF].set(p["bf1"])
    w = w.at[ROW_BF2, 0:D_MODEL].set(p["bf2"])
    w = w.at[ROW_G2, 0:D_MODEL].set(p["g2"])
    w = w.at[ROW_BE2, 0:D_MODEL].set(p["be2"])
    w = w.at[ROW_B_OUT, 0:C_OUT].set(p["b_out"])
    return w


@jax.jit
def hf_advanced_forward(x_enc, x_mark_enc, x_dec, x_mark_dec, w_slab):
    """HFAdvancedModelWrapper.forward (no extensions -> backbone only)."""
    # Single combined activation slab [BL+BP, 2*IN_PAD]:
    #   rows 0:BL   = [x_enc | x_mark_enc | 0] in lanes 0:IN_PAD
    #   rows BL:end = [x_dec_tail | x_mark_dec_tail | 0] in lanes IN_PAD:2*IN_PAD
    # Block-diagonal against the stacked embedding weight -> one matmul in-kernel.
    pad_e = jnp.zeros((B, SEQ_LEN, IN_PAD - ENC_IN - MARK), x_enc.dtype)
    xe = jnp.concatenate([x_enc, x_mark_enc, pad_e], axis=-1).reshape(BL, IN_PAD)
    pad_d = jnp.zeros((B, PRED, IN_PAD - DEC_IN - MARK), x_dec.dtype)
    xd = jnp.concatenate(
        [x_dec[:, -PRED:, :], x_mark_dec[:, -PRED:, :], pad_d], axis=-1).reshape(BP, IN_PAD)

    xa = jnp.zeros((BL + BP, 2 * IN_PAD), jnp.float32)
    xa = xa.at[0:BL, 0:IN_PAD].set(xe.astype(jnp.float32))
    xa = xa.at[BL:BL + BP, IN_PAD:2 * IN_PAD].set(xd.astype(jnp.float32))

    # Gridless: one kernel invocation, whole arrays in VMEM,
    # 2 input DMAs total (1 activation slab + 1 packed parameter slab),
    # 1 lane-dense [BP,128] output DMA.
    out = pl.pallas_call(
        backbone_kernel,
        out_shape=jax.ShapeDtypeStruct((BP, W_COLS), jnp.float32),
    )(xa, w_slab)
    return out[:, :C_OUT].reshape(B, PRED, C_OUT)


def reference_forward(x_enc, x_mark_enc, x_dec, x_mark_dec, p):
    """Pure-JAX reference of the same backbone (for sanity checking)."""
    def ln(x, g, b, eps=1e-5):
        mu = x.mean(-1, keepdims=True)
        var = ((x - mu) ** 2).mean(-1, keepdims=True)
        return (x - mu) / jnp.sqrt(var + eps) * g + b

    enc = x_enc @ p["w_emb"] + x_mark_enc @ p["w_mark"] + p["b_emb"]
    q, k, v = enc @ p["wq"], enc @ p["wk"], enc @ p["wv"]
    sc = jnp.einsum("bld,bmd->blm", q, k) / jnp.sqrt(jnp.float32(D_MODEL))
    attn = jax.nn.softmax(sc, axis=-1)
    att_out = jnp.einsum("blm,bmd->bld", attn, v) @ p["wo"]
    h = ln(enc + att_out, p["g1"], p["be1"])
    ff = jax.nn.relu(h @ p["w1"] + p["bf1"]) @ p["w2"] + p["bf2"]
    enc_out = ln(h + ff, p["g2"], p["be2"])
    dec = (x_dec[:, -PRED:, :] @ p["w_dec"]
           + x_mark_dec[:, -PRED:, :] @ p["w_mark_dec"] + p["b_dec"])
    y = jnp.einsum("pl,bld->bpd", p["w_time"], enc_out) + dec
    return y @ p["w_out"] + p["b_out"]


if __name__ == "__main__":
    key = jax.random.PRNGKey(0)
    k_in, k_par = jax.random.split(key)
    k1, k2, k3, k4 = jax.random.split(k_in, 4)

    x_enc = jax.random.normal(k1, (B, SEQ_LEN, ENC_IN), dtype=jnp.float32)
    x_mark_enc = jax.random.normal(k2, (B, SEQ_LEN, MARK), dtype=jnp.float32)
    x_dec = jax.random.normal(k3, (B, DEC_LEN, DEC_IN), dtype=jnp.float32)
    x_mark_dec = jax.random.normal(k4, (B, DEC_LEN, MARK), dtype=jnp.float32)

    params = init_params(k_par)
    w_slab = pack_params(params)                  # packed once, off the hot path

    out = hf_advanced_forward(x_enc, x_mark_enc, x_dec, x_mark_dec, w_slab)
    out = jax.block_until_ready(out)

    ref = reference_forward(x_enc, x_mark_enc, x_dec, x_mark_dec, params)
    assert out.shape == (B, PRED, C_OUT), out.shape
    assert bool(jnp.all(jnp.isfinite(out)))
    # Softmax now uses exact division (typical agreement ~1e-5); the tolerance
    # below also covers XLA's default reduced-precision f32 matmuls in the
    # pure-JAX reference vs. the MXU kernel.
    assert bool(jnp.allclose(out, ref, rtol=1e-2, atol=1e-2)), (
        float(jnp.max(jnp.abs(out - ref))))

    print("KERNEL_OK")
</pallas_src>

<mosaic_0001>
module attributes {stable_mosaic.version = 11 : i64} {
  func.func @backbone_kernel(%arg0: memref<24x16xf32, #tpu.memory_space<vmem>>, %arg1: memref<216x128xf32, #tpu.memory_space<vmem>>, %arg2: memref<8x128xf32, #tpu.memory_space<vmem>>) attributes {dimension_semantics = [], scalar_prefetch = 0 : i64, scratch_operands = 0 : i64, tpu.core_type = #tpu.core_type<tc>} {
    %c0 = arith.constant 0 : index
    %c0_0 = arith.constant 0 : index
    %0 = vector.load %arg0[%c0, %c0_0] : memref<24x16xf32, #tpu.memory_space<vmem>>, vector<24x16xf32>
    %c0_1 = arith.constant 0 : index
    %c0_2 = arith.constant 0 : index
    %1 = vector.load %arg1[%c0_1, %c0_2] : memref<216x128xf32, #tpu.memory_space<vmem>>, vector<32x128xf32>
    %c32 = arith.constant 32 : index
    %c0_3 = arith.constant 0 : index
    %2 = vector.load %arg1[%c32, %c0_3] : memref<216x128xf32, #tpu.memory_space<vmem>>, vector<16x32xf32>
    %c48 = arith.constant 48 : index
    %c0_4 = arith.constant 0 : index
    %3 = vector.load %arg1[%c48, %c0_4] : memref<216x128xf32, #tpu.memory_space<vmem>>, vector<32x64xf32>
    %c80 = arith.constant 80 : index
    %c0_5 = arith.constant 0 : index
    %4 = vector.load %arg1[%c80, %c0_5] : memref<216x128xf32, #tpu.memory_space<vmem>>, vector<64x32xf32>
    %c144 = arith.constant 144 : index
    %c0_6 = arith.constant 0 : index
    %5 = vector.load %arg1[%c144, %c0_6] : memref<216x128xf32, #tpu.memory_space<vmem>>, vector<8x16xf32>
    %c152 = arith.constant 152 : index
    %c0_7 = arith.constant 0 : index
    %6 = vector.load %arg1[%c152, %c0_7] : memref<216x128xf32, #tpu.memory_space<vmem>>, vector<32x128xf32>
    %c184 = arith.constant 184 : index
    %c0_8 = arith.constant 0 : index
    %7 = vector.load %arg1[%c184, %c0_8] : memref<216x128xf32, #tpu.memory_space<vmem>>, vector<16x16xf32>
    %c200 = arith.constant 200 : index
    %c0_9 = arith.constant 0 : index
    %8 = vector.load %arg1[%c200, %c0_9] : memref<216x128xf32, #tpu.memory_space<vmem>>, vector<1x32xf32>
    %c201 = arith.constant 201 : index
    %c0_10 = arith.constant 0 : index
    %9 = vector.load %arg1[%c201, %c0_10] : memref<216x128xf32, #tpu.memory_space<vmem>>, vector<1x32xf32>
    %c202 = arith.constant 202 : index
    %c0_11 = arith.constant 0 : index
    %10 = vector.load %arg1[%c202, %c0_11] : memref<216x128xf32, #tpu.memory_space<vmem>>, vector<1x32xf32>
    %c203 = arith.constant 203 : index
    %c0_12 = arith.constant 0 : index
    %11 = vector.load %arg1[%c203, %c0_12] : memref<216x128xf32, #tpu.memory_space<vmem>>, vector<1x32xf32>
    %c204 = arith.constant 204 : index
    %c0_13 = arith.constant 0 : index
    %12 = vector.load %arg1[%c204, %c0_13] : memref<216x128xf32, #tpu.memory_space<vmem>>, vector<1x64xf32>
    %c205 = arith.constant 205 : index
    %c0_14 = arith.constant 0 : index
    %13 = vector.load %arg1[%c205, %c0_14] : memref<216x128xf32, #tpu.memory_space<vmem>>, vector<1x32xf32>
    %c206 = arith.constant 206 : index
    %c0_15 = arith.constant 0 : index
    %14 = vector.load %arg1[%c206, %c0_15] : memref<216x128xf32, #tpu.memory_space<vmem>>, vector<1x32xf32>
    %c207 = arith.constant 207 : index
    %c0_16 = arith.constant 0 : index
    %15 = vector.load %arg1[%c207, %c0_16] : memref<216x128xf32, #tpu.memory_space<vmem>>, vector<1x32xf32>
    %c208 = arith.constant 208 : index
    %c0_17 = arith.constant 0 : index
    %16 = vector.load %arg1[%c208, %c0_17] : memref<216x128xf32, #tpu.memory_space<vmem>>, vector<1x128xf32>
    %cst = arith.constant dense<0.000000e+00> : vector<24x32xf32>
    %17 = tpu.matmul %0, %2, %cst {dimension_numbers = #tpu.dot_dimension_numbers<[1], [0], [0], [1], [0, 0, 1, 1], [], []>} : vector<24x16xf32>, vector<16x32xf32>, vector<24x32xf32> -> vector<24x32xf32>
    %18 = vector.extract_strided_slice %17 {offsets = [0, 0], sizes = [16, 32], strides = [1, 1]} : vector<24x32xf32> to vector<16x32xf32>
    %19 = vector.broadcast %8 : vector<1x32xf32> to vector<16x32xf32>
    %20 = arith.addf %18, %19 : vector<16x32xf32>
    %21 = vector.extract_strided_slice %17 {offsets = [16, 0], sizes = [8, 32], strides = [1, 1]} : vector<24x32xf32> to vector<8x32xf32>
    %22 = vector.broadcast %9 : vector<1x32xf32> to vector<8x32xf32>
    %23 = arith.addf %21, %22 : vector<8x32xf32>
    %cst_18 = arith.constant dense<0.000000e+00> : vector<16x128xf32>
    %24 = tpu.matmul %20, %1, %cst_18 {dimension_numbers = #tpu.dot_dimension_numbers<[1], [0], [0], [1], [0, 0, 1, 1], [], []>} : vector<16x32xf32>, vector<32x128xf32>, vector<16x128xf32> -> vector<16x128xf32>
    %25 = vector.extract_strided_slice %24 {offsets = [0, 0], sizes = [16, 32], strides = [1, 1]} : vector<16x128xf32> to vector<16x32xf32>
    %26 = vector.extract_strided_slice %24 {offsets = [0, 32], sizes = [16, 32], strides = [1, 1]} : vector<16x128xf32> to vector<16x32xf32>
    %27 = vector.extract_strided_slice %24 {offsets = [0, 64], sizes = [16, 32], strides = [1, 1]} : vector<16x128xf32> to vector<16x32xf32>
    %28 = vector.extract_strided_slice %1 {offsets = [0, 96], sizes = [32, 32], strides = [1, 1]} : vector<32x128xf32> to vector<32x32xf32>
    %cst_19 = arith.constant dense<0.000000e+00> : vector<16x16xf32>
    %29 = tpu.matmul %25, %26, %cst_19 {dimension_numbers = #tpu.dot_dimension_numbers<[1], [1], [0], [0], [0, 0, 1, 0], [], []>} : vector<16x32xf32>, vector<16x32xf32>, vector<16x16xf32> -> vector<16x16xf32>
    %30 = arith.addf %29, %7 : vector<16x16xf32>
    %cst_20 = arith.constant dense<0xFF800000> : vector<16xf32>
    %31 = vector.multi_reduction <maximumf>, %30, %cst_20 [1] : vector<16x16xf32> to vector<16xf32>
    %32 = vector.shape_cast %31 : vector<16xf32> to vector<16x1xf32>
    %33 = vector.broadcast %32 : vector<16x1xf32> to vector<16x16xf32>
    %34 = arith.subf %30, %33 : vector<16x16xf32>
    %35 = math.exp %34 : vector<16x16xf32>
    %cst_21 = arith.constant dense<0.000000e+00> : vector<16xf32>
    %36 = vector.multi_reduction <add>, %35, %cst_21 [1] : vector<16x16xf32> to vector<16xf32>
    %37 = vector.shape_cast %36 : vector<16xf32> to vector<16x1xf32>
    %38 = vector.broadcast %37 : vector<16x1xf32> to vector<16x16xf32>
    %39 = arith.divf %35, %38 : vector<16x16xf32>
    %cst_22 = arith.constant dense<0.000000e+00> : vector<16x32xf32>
    %40 = tpu.matmul %39, %27, %cst_22 {dimension_numbers = #tpu.dot_dimension_numbers<[1], [0], [0], [1], [0, 0, 1, 1], [], []>} : vector<16x16xf32>, vector<16x32xf32>, vector<16x32xf32> -> vector<16x32xf32>
    %cst_23 = arith.constant dense<0.000000e+00> : vector<16x32xf32>
    %41 = tpu.matmul %40, %28, %cst_23 {dimension_numbers = #tpu.dot_dimension_numbers<[1], [0], [0], [1], [0, 0, 1, 1], [], []>} : vector<16x32xf32>, vector<32x32xf32>, vector<16x32xf32> -> vector<16x32xf32>
    %42 = arith.addf %20, %41 : vector<16x32xf32>
    %cst_24 = arith.constant dense<0.000000e+00> : vector<16xf32>
    %43 = vector.multi_reduction <add>, %42, %cst_24 [1] : vector<16x32xf32> to vector<16xf32>
    %44 = vector.shape_cast %43 : vector<16xf32> to vector<16x1xf32>
    %cst_25 = arith.constant 3.200000e+01 : f32
    %45 = vector.broadcast %cst_25 : f32 to vector<16x1xf32>
    %46 = arith.divf %44, %45 : vector<16x1xf32>
    %47 = vector.broadcast %46 : vector<16x1xf32> to vector<16x32xf32>
    %48 = arith.subf %42, %47 : vector<16x32xf32>
    %49 = arith.mulf %48, %48 : vector<16x32xf32>
    %cst_26 = arith.constant dense<0.000000e+00> : vector<16xf32>
    %50 = vector.multi_reduction <add>, %49, %cst_26 [1] : vector<16x32xf32> to vector<16xf32>
    %51 = vector.shape_cast %50 : vector<16xf32> to vector<16x1xf32>
    %cst_27 = arith.constant 3.200000e+01 : f32
    %52 = vector.broadcast %cst_27 : f32 to vector<16x1xf32>
    %53 = arith.divf %51, %52 : vector<16x1xf32>
    %54 = vector.broadcast %46 : vector<16x1xf32> to vector<16x32xf32>
    %55 = arith.subf %42, %54 : vector<16x32xf32>
    %cst_28 = arith.constant 9.99999974E-6 : f32
    %56 = vector.broadcast %cst_28 : f32 to vector<16x1xf32>
    %57 = arith.addf %53, %56 : vector<16x1xf32>
    %58 = math.rsqrt %57 : vector<16x1xf32>
    %59 = vector.broadcast %58 : vector<16x1xf32> to vector<16x32xf32>
    %60 = arith.mulf %55, %59 : vector<16x32xf32>
    %61 = vector.broadcast %10 : vector<1x32xf32> to vector<16x32xf32>
    %62 = arith.mulf %60, %61 : vector<16x32xf32>
    %63 = vector.broadcast %11 : vector<1x32xf32> to vector<16x32xf32>
    %64 = arith.addf %62, %63 : vector<16x32xf32>
    %cst_29 = arith.constant dense<0.000000e+00> : vector<16x64xf32>
    %65 = tpu.matmul %64, %3, %cst_29 {dimension_numbers = #tpu.dot_dimension_numbers<[1], [0], [0], [1], [0, 0, 1, 1], [], []>} : vector<16x32xf32>, vector<32x64xf32>, vector<16x64xf32> -> vector<16x64xf32>
    %66 = vector.broadcast %12 : vector<1x64xf32> to vector<16x64xf32>
    %67 = arith.addf %65, %66 : vector<16x64xf32>
    %cst_30 = arith.constant 0.000000e+00 : f32
    %68 = vector.broadcast %cst_30 : f32 to vector<16x64xf32>
    %69 = arith.maximumf %67, %68 : vector<16x64xf32>
    %cst_31 = arith.constant dense<0.000000e+00> : vector<16x32xf32>
    %70 = tpu.matmul %69, %4, %cst_31 {dimension_numbers = #tpu.dot_dimension_numbers<[1], [0], [0], [1], [0, 0, 1, 1], [], []>} : vector<16x64xf32>, vector<64x32xf32>, vector<16x32xf32> -> vector<16x32xf32>
    %71 = vector.broadcast %13 : vector<1x32xf32> to vector<16x32xf32>
    %72 = arith.addf %70, %71 : vector<16x32xf32>
    %73 = arith.addf %64, %72 : vector<16x32xf32>
    %cst_32 = arith.constant dense<0.000000e+00> : vector<16xf32>
    %74 = vector.multi_reduction <add>, %73, %cst_32 [1] : vector<16x32xf32> to vector<16xf32>
    %75 = vector.shape_cast %74 : vector<16xf32> to vector<16x1xf32>
    %cst_33 = arith.constant 3.200000e+01 : f32
    %76 = vector.broadcast %cst_33 : f32 to vector<16x1xf32>
    %77 = arith.divf %75, %76 : vector<16x1xf32>
    %78 = vector.broadcast %77 : vector<16x1xf32> to vector<16x32xf32>
    %79 = arith.subf %73, %78 : vector<16x32xf32>
    %80 = arith.mulf %79, %79 : vector<16x32xf32>
    %cst_34 = arith.constant dense<0.000000e+00> : vector<16xf32>
    %81 = vector.multi_reduction <add>, %80, %cst_34 [1] : vector<16x32xf32> to vector<16xf32>
    %82 = vector.shape_cast %81 : vector<16xf32> to vector<16x1xf32>
    %cst_35 = arith.constant 3.200000e+01 : f32
    %83 = vector.broadcast %cst_35 : f32 to vector<16x1xf32>
    %84 = arith.divf %82, %83 : vector<16x1xf32>
    %85 = vector.broadcast %77 : vector<16x1xf32> to vector<16x32xf32>
    %86 = arith.subf %73, %85 : vector<16x32xf32>
    %cst_36 = arith.constant 9.99999974E-6 : f32
    %87 = vector.broadcast %cst_36 : f32 to vector<16x1xf32>
    %88 = arith.addf %84, %87 : vector<16x1xf32>
    %89 = math.rsqrt %88 : vector<16x1xf32>
    %90 = vector.broadcast %89 : vector<16x1xf32> to vector<16x32xf32>
    %91 = arith.mulf %86, %90 : vector<16x32xf32>
    %92 = vector.broadcast %14 : vector<1x32xf32> to vector<16x32xf32>
    %93 = arith.mulf %91, %92 : vector<16x32xf32>
    %94 = vector.broadcast %15 : vector<1x32xf32> to vector<16x32xf32>
    %95 = arith.addf %93, %94 : vector<16x32xf32>
    %cst_37 = arith.constant dense<0.000000e+00> : vector<8x32xf32>
    %96 = tpu.matmul %5, %95, %cst_37 {dimension_numbers = #tpu.dot_dimension_numbers<[1], [0], [0], [1], [0, 0, 1, 1], [], []>} : vector<8x16xf32>, vector<16x32xf32>, vector<8x32xf32> -> vector<8x32xf32>
    %97 = arith.addf %96, %23 : vector<8x32xf32>
    %cst_38 = arith.constant dense<0.000000e+00> : vector<8x128xf32>
    %98 = tpu.matmul %97, %6, %cst_38 {dimension_numbers = #tpu.dot_dimension_numbers<[1], [0], [0], [1], [0, 0, 1, 1], [], []>} : vector<8x32xf32>, vector<32x128xf32>, vector<8x128xf32> -> vector<8x128xf32>
    %99 = vector.broadcast %16 : vector<1x128xf32> to vector<8x128xf32>
    %100 = arith.addf %98, %99 : vector<8x128xf32>
    %c0_39 = arith.constant 0 : index
    %c0_40 = arith.constant 0 : index
    %101 = vector.load %arg2[%c0_39, %c0_40] : memref<8x128xf32, #tpu.memory_space<vmem>>, vector<8x128xf32>
    tpu.vector_store %arg2[%c0_39, %c0_40], %100 {strides = array<i32>} : memref<8x128xf32, #tpu.memory_space<vmem>>, vector<8x128xf32>,
    return
  }
}

</mosaic_0001>

<bundles_post_ra>
// kernel: hf_advanced_forward.1
= control target key start
LH: loop header
LB: loop body
LE: loop exit
PB: predicated region body
PF: predicated region fallthrough
CT: control target
= control target key end

     0   :  { %v1164_v1 = vmov 0.0   ;;  %vm1165_vm0 = vmmov 0   ;;  %vm49_vm1 = vcmask 130048   ;;  %s1369_s0 = inlined_call_operand.vmem [shape: f32[24,16], index: 0, kind: input, shape index: {}]   ;;  %s1370_s1 = inlined_call_operand.vmem [shape: f32[216,128], index: 1, kind: input, shape index: {}]   ;;  %s1371_s2 = inlined_call_operand.hbm [shape: f32[8,128], index: 2, kind: output, shape index: {}]  }
   0x1   :  { %v20_v0 = vld [vmem:[%s1370_s1 + $0x28] sm:$0xff]  ;;  %1023 = vmatprep.subr.mxu0 %v1164_v1  ;;  %v19_v2 = vld [vmem:[%s1370_s1 + $0x20] sm:$0xff]  ;;  %1027 = vmatprep.mubr.msk.f32.mxu0 %vm1165_vm0, %v1164_v1  ;;  %v1197_v3 = vld [vmem:[%s1370_s1 + $0x18] sm:$0xff] }
   0x2   :  { %1024 = vmatpush3.msra.mxu0 %v20_v0  ;;  %v12_v4 = vld [vmem:[%s1369_s0] sm:$0xff]  ;;  %1036 = vmatprep.subr.mxu1 %v1197_v3 }
   0x3   :  { %7 = vsyncpa [#allocation3], 0  ;;  %1025 = vmatprep.subr.mxu0 %v1164_v1  ;;  %1037 = vmatpush3.msra.mxu1 %v1197_v3  ;;  %v13_v5 = vld [vmem:[%s1369_s0 + $0x8] sm:$0xff]  ;;  %v1217_v6 = vld [vmem:[%s1370_s1 + $0x10] sm:$0xff]  ;;  %vm150_vm2 = vcmask 261120   ;;  %s1166_s29 = smov 96  }
   0x4   :  { %1026 = vmatpush3.msra.mxu0 %v19_v2  ;;  %1038 = vmatprep.subr.mxu1 %v1217_v6  ;;  %v16_v7 = vld [vmem:[%s1370_s1 + $0x8] sm:$0xff]  ;;  %v15_v8 = vld [vmem:[%s1370_s1] sm:$0xff]  ;;  %v14_v16 = vld [vmem:[%s1369_s0 + $0x10] sm:$0xff]  ;;  %s1167_s5 = smov 64   ;;  %s1168_s6 = smov 32   ;;  %vm659_vm3 = vcmask 523264  }
   0x5   :  { %1028 = vmatmul.mubr.msk.f32.vlgmr.msra.gmra.mxu0 %vm49_vm1, %v12_v4  ;;  %1039 = vmatpush3.msra.mxu1 %v1217_v6  ;;  %v949_v9 = vld [vmem:[%s1370_s1 + $0xc8] ss:$0 sm:$0xff]  ;;  %v38_v24 = vld [vmem:[%s1370_s1 + $0xb8] sm:$0xff]  ;;  %v39_v25 = vld [vmem:[%s1370_s1 + $0xc0] sm:$0xff]  ;;  %s1169_s28 = smov [#allocation2]  }
   0x6   :  { %1030 = vmatprep.mubr.msk.f32.mxu0 %vm1165_vm0, %v1164_v1  ;;  %1040 = vmatprep.subr.mxu1 %v16_v7 }
   0x7   :  { %1041 = vmatpush3.msra.mxu1 %v16_v7 }
   0x8   :  { %1042 = vmatprep.subr.mxu1 %v15_v8 }
   0x9   :  { %1031 = vmatmul.mubr.msk.f32.gmra.mxu0 %vm49_vm1, %v13_v5  ;;  %1043 = vmatpush3.msra.mxu1 %v15_v8 }
   0xa   :  { %1033 = vmatprep.mubr.msk.f32.mxu0 %vm1165_vm0, %v1164_v1 }
   0xd   :  { %1034 = vmatmul.mubr.msk.f32.gmra.mxu0 %vm49_vm1, %v14_v16 }
  0xc5   :  { %v125_v10 = vpop.f32.mrf.mxu0 }
  0xc6   :  { %v1230_v11 = vadd.f32 %v949_v9, %v125_v10  ;;  %v22_v10 = vld [vmem:[%s1370_s1 + $0x38] sm:$0xff] }
  0xc7   :  { %v1029_v12 = vpop.f32.mrf.mxu0 }
  0xc8   :  { %1044 = vmatprep.mubr.msk.f32.mxu1 %vm150_vm2, %v1230_v11  ;;  %v32_v12 = vld [vmem:[%s1370_s1 + $0x88] sm:$0xff] }
  0xc9   :  { %v130_v13 = vpop.f32.mrf.mxu0 }
  0xca   :  { %v1234_v14 = vadd.f32 %v949_v9, %v130_v13  ;;  %v23_v9 = vld [vmem:[%s1370_s1 + $0x40] sm:$0xff] }
  0xcb   :  { %v1032_v15 = vpop.f32.mrf.mxu0  ;;  %v31_v13 = vld [vmem:[%s1370_s1 + $0x80] sm:$0xff] }
  0xcc   :  { %1045 = vmatmul.mubr.msk.f32.vlgmr.msra.gmra.mxu1 %vm150_vm2, %v1234_v14  ;;  %v29_v15 = vld [vmem:[%s1370_s1 + $0x70] sm:$0xff] }
  0xcd   :  { %v1243_v19 = vpop.f32.mrf.mxu0 }
  0xcf   :  { %v1035_v20 = vpop.f32.mrf.mxu0 }
 0x18c   :  { %v1046_v17 = vpop.f32.mrf.mxu1 }
 0x18d   :  { %236 = vrot.lane.b32.xlu0 %v1046_v17, %s1166_s29 }
 0x18e   :  { %v223_v18 = vpop.f32.mrf.mxu1 }
 0x18f   :  { %1051 = vmatprep.mubr.msk.f32.mxu0 %vm150_vm2, %v223_v18 }
 0x191   :  { %234 = vrot.lane.b32.xlu0 %v223_v18, %s1166_s29  ;;  %s938_s29 = sshll.u32 %s1169_s28, 4  ;;  %s939_s29 = int_to_ptr.vmem [resolvable:$true] %s938_s29 }
 0x192   :  { %s1142_s0 = scalar_lea.vmem %s939_s29, 128  ;;  %p1147_p1 = scmp.lt.s32.totalorder %s939_s29, %s939_s29 }
 0x193   :  { %p1143_p0 = scmp.ne.s32.totalorder %s939_s29, %s1142_s0  ;;  %p1148_p2 = scmp.lt.s32.totalorder %s1142_s0, %s1142_s0 }
 0x195   :  { %p1149_p3 = por %p1148_p2, %p1147_p1 }
 0x197   :  { %p1150_p4 = pnand %p1149_p3, %p1143_p0 }
 0x1ff   :  { %v237_v21 = vpop.permute.xlu0 %236 }
 0x200   :  { %1047 = vmatprep.subr.msk.mxu0 %vm150_vm2, %v237_v21 }
 0x201   :  { %1048 = vmatpush3.xpose.msk.msra.mxu0 %vm150_vm2, %v237_v21 }
 0x203   :  { %v235_v22 = vpop.permute.xlu0 %234 }
 0x204   :  { %1049 = vmatprep.subr.msk.mxu0 %vm150_vm2, %v235_v22 }
 0x205   :  { %1050 = vmatpush3.xpose.msk.msra.mxu0 %vm150_vm2, %v235_v22 }
 0x208   :  { %1052 = vmatmul.mubr.msk.f32.vlgmr.msra.gmra.mxu0 %vm150_vm2, %v1046_v17 }
 0x2c8   :  { %v1053_v23 = vpop.f32.mrf.mxu0 }
 0x2c9   :  { %v318_v28 = vadd.f32 %v1053_v23, %v39_v25 }
 0x2ca   :  { %v312_v26 = vpop.f32.mrf.mxu0 }
 0x2cb   :  { %v313_v27 = vadd.f32 %v312_v26, %v38_v24  ;;  %v324_v30 = vsel %vm49_vm1, %v318_v28, -inf  ;;  %v961_v24 = vld [vmem:[%s1370_s1 + $0xca] ss:$0 sm:$0xff]  ;;  %v962_v26 = vld [vmem:[%s1370_s1 + $0xcb] ss:$0 sm:$0xff] }
 0x2cd   :  { %v321_v29 = vsel %vm49_vm1, %v313_v27, -inf }
 0x2ce   :  { %322 = vmax.xlane.f32.xlu1 %v321_v29 }
 0x2d2   :  { %325 = vmax.xlane.f32.xlu1 %v324_v30 }
 0x357   :  { %v323_v31 = vpop.xlane.xlu1 %322 }
 0x358   :  { %v327_v32 = vsub.f32 %v313_v27, %v323_v31 }
 0x35a   :  { %v329_v33 = vmul.f32 1.442695, %v327_v32 }
 0x35b   :  { %v326_v34 = vpop.xlane.xlu1 %325 }
 0x35c   :  { %1126 = vpow2.f32 %v329_v33  ;;  %v328_v35 = vsub.f32 %v318_v28, %v326_v34  ;;  %v28_v33 = vld [vmem:[%s1370_s1 + $0x68] sm:$0xff]  ;;  %v27_v34 = vld [vmem:[%s1370_s1 + $0x60] sm:$0xff] }
 0x35e   :  { %v331_v36 = vmul.f32 1.442695, %v328_v35  ;;  %v26_v35 = vld [vmem:[%s1370_s1 + $0x58] sm:$0xff] }
 0x360   :  { %1128 = vpow2.f32 %v331_v36  ;;  %v25_v36 = vld [vmem:[%s1370_s1 + $0x50] sm:$0xff] }
 0x369   :  { %v1127_v37 = vpop.eup %1126 }
 0x36a   :  { %v333_v38 = vsel %vm49_vm1, %v1127_v37, 0.0 }
 0x36b   :  { %334 = vadd.xlane.f32.xlu0 %v333_v38 }
 0x36d   :  { %v1129_v39 = vpop.eup %1128 }
 0x36e   :  { %v336_v40 = vsel %vm49_vm1, %v1129_v39, 0.0 }
 0x36f   :  { %337 = vadd.xlane.f32.xlu1 %v336_v40 }
 0x380   :  { %345 = vrot.lane.b32.xlu1 %v1046_v17, %s1167_s5 }
 0x381   :  { %436 = vrot.lane.b32.xlu0 %v16_v7, %s1168_s6 }
 0x384   :  { %343 = vrot.lane.b32.xlu1 %v223_v18, %s1167_s5 }
 0x388   :  { %440 = vrot.lane.b32.xlu1 %v1197_v3, %s1168_s6 }
 0x38c   :  { %438 = vrot.lane.b32.xlu1 %v1217_v6, %s1168_s6 }
 0x390   :  { %434 = vrot.lane.b32.xlu1 %v15_v8, %s1168_s6  ;;  %v24_v8 = vld [vmem:[%s1370_s1 + $0x48] sm:$0xff] }
 0x391   :  { %1072 = vmatprep.subr.mxu0 %v24_v8 }
 0x392   :  { %1073 = vmatpush3.msra.mxu0 %v24_v8 }
 0x393   :  { %1074 = vmatprep.subr.mxu0 %v23_v9 }
 0x394   :  { %1075 = vmatpush3.msra.mxu0 %v23_v9 }
 0x395   :  { %1076 = vmatprep.subr.mxu0 %v22_v10 }
 0x396   :  { %1077 = vmatpush3.msra.mxu0 %v22_v10  ;;  %v970_v10 = vld [vmem:[%s1370_s1 + $0xcf] ss:$0 sm:$0xff] }
 0x3f4   :  { %v335_v41 = vpop.xlane.xlu0 %334 }
 0x3f5   :  { %1130 = vrcp.f32 %v335_v41 }
 0x3f8   :  { %v338_v42 = vpop.xlane.xlu1 %337  ;;  %v437_v51 = vpop.permute.xlu0 %436 }
 0x3f9   :  { %1132 = vrcp.f32 %v338_v42 }
 0x3fc   :  { %v346_v43 = vpop.permute.xlu1 %345 }
 0x3fd   :  { %1054 = vmatprep.subr.mxu1 %v346_v43 }
 0x3fe   :  { %1055 = vmatpush3.msra.mxu1 %v346_v43 }
 0x400   :  { %v344_v44 = vpop.permute.xlu1 %343 }
 0x401   :  { %1056 = vmatprep.subr.mxu1 %v344_v44 }
 0x402   :  { %v1131_v45 = vpop.eup %1130  ;;  %1057 = vmatpush3.msra.mxu1 %v344_v44  ;;  %v966_v44 = vld [vmem:[%s1370_s1 + $0xcd] ss:$0 sm:$0xff] }
 0x403   :  { %v340_v46 = vmul.f32 %v1131_v45, %v1127_v37  ;;  %v963_v37 = vld [vmem:[%s1370_s1 + $0xcc] ss:$0 sm:$0xff] }
 0x404   :  { %v441_v47 = vpop.permute.xlu1 %440 }
 0x405   :  { %1058 = vmatprep.mubr.msk.f32.mxu1 %vm49_vm1, %v340_v46  ;;  %1061 = vmatprep.subr.mxu1 %v441_v47 }
 0x406   :  { %v1133_v48 = vpop.eup %1132 }
 0x407   :  { %v342_v49 = vmul.f32 %v1133_v48, %v1129_v39 }
 0x408   :  { %v439_v50 = vpop.permute.xlu1 %438 }
 0x409   :  { %1059 = vmatmul.mubr.msk.f32.vlgmr.msra.gmra.mxu1 %vm49_vm1, %v342_v49 }
 0x40a   :  { %1062 = vmatpush3.msra.mxu1 %v441_v47 }
 0x40b   :  { %1063 = vmatprep.subr.mxu1 %v439_v50 }
 0x40c   :  { %1064 = vmatpush3.msra.mxu1 %v439_v50  ;;  %v435_v52 = vpop.permute.xlu1 %434 }
 0x40d   :  { %1065 = vmatprep.subr.mxu1 %v437_v51 }
 0x40e   :  { %1066 = vmatpush3.msra.mxu1 %v437_v51 }
 0x40f   :  { %1067 = vmatprep.subr.mxu1 %v435_v52 }
 0x410   :  { %1068 = vmatpush3.msra.mxu1 %v435_v52 }
 0x411   :  { %1083 = vmatprep.subr.mxu1 %v32_v12 }
 0x4c9   :  { %v1060_v53 = vpop.f32.mrf.mxu1 }
 0x4cb   :  { %v421_v54 = vpop.f32.mrf.mxu1 }
 0x4cc   :  { %1069 = vmatprep.mubr.msk.f32.mxu1 %vm150_vm2, %v421_v54 }
 0x4cd   :  { %1070 = vmatmul.mubr.msk.f32.vlgmr.msra.gmra.mxu1 %vm150_vm2, %v1060_v53 }
 0x4ce   :  { %1084 = vmatpush3.msra.mxu1 %v32_v12 }
 0x4cf   :  { %1085 = vmatprep.subr.mxu1 %v31_v13 }
 0x4d0   :  { %1086 = vmatpush3.msra.mxu1 %v31_v13 }
 0x58d   :  { %v1071_v55 = vpop.f32.mrf.mxu1 }
 0x58e   :  { %v528_v56 = vadd.f32 %v1071_v55, %v1234_v14  ;;  %v30_v14 = vld [vmem:[%s1370_s1 + $0x78] sm:$0xff] }
 0x58f   :  { %v518_v57 = vpop.f32.mrf.mxu1  ;;  %1087 = vmatprep.subr.mxu1 %v30_v14 }
 0x590   :  { %v527_v58 = vadd.f32 %v518_v57, %v1230_v11  ;;  %v532_v59 = vsel %vm150_vm2, %v528_v56, 0.0  ;;  %v21_v11 = vld [vmem:[%s1370_s1 + $0x30] sm:$0xff]  ;;  %1088 = vmatpush3.msra.mxu1 %v30_v14 }
 0x591   :  { %533 = vadd.xlane.f32.xlu0 %v532_v59  ;;  %1078 = vmatprep.subr.mxu0 %v21_v11 }
 0x592   :  { %v529_v60 = vsel %vm150_vm2, %v527_v58, 0.0  ;;  %1079 = vmatpush3.msra.mxu0 %v21_v11  ;;  %1089 = vmatprep.subr.mxu1 %v29_v15 }
 0x593   :  { %530 = vadd.xlane.f32.xlu1 %v529_v60  ;;  %1102 = vmatprep.subr.mxu0 %v1164_v1 }
 0x594   :  { %1090 = vmatpush3.msra.mxu1 %v29_v15 }
 0x595   :  { %1091 = vmatprep.subr.mxu1 %v28_v33 }
 0x596   :  { %1092 = vmatpush3.msra.mxu1 %v28_v33 }
 0x597   :  { %1093 = vmatprep.subr.mxu1 %v27_v34 }
 0x598   :  { %1094 = vmatpush3.msra.mxu1 %v27_v34 }
 0x599   :  { %1095 = vmatprep.subr.mxu1 %v26_v35 }
 0x59a   :  { %1096 = vmatpush3.msra.mxu1 %v26_v35 }
 0x59b   :  { %1097 = vmatprep.subr.mxu1 %v25_v36 }
 0x59c   :  { %1098 = vmatpush3.msra.mxu1 %v25_v36 }
 0x61a   :  { %v534_v61 = vpop.xlane.xlu0 %533 }
 0x61b   :  { %v537_v62 = vmul.f32 0.03125, %v534_v61 }
 0x61c   :  { %v531_v63 = vpop.xlane.xlu1 %530 }
 0x61d   :  { %v536_v0 = vmul.f32 0.03125, %v531_v63  ;;  %v539_v2 = vsub.f32 %v528_v56, %v537_v62 }
 0x61f   :  { %v538_v3 = vsub.f32 %v527_v58, %v536_v0  ;;  %v541_v6 = vmul.f32 %v539_v2, %v539_v2 }
 0x621   :  { %v540_v4 = vmul.f32 %v538_v3, %v538_v3  ;;  %v545_v7 = vsel %vm150_vm2, %v541_v6, 0.0 }
 0x623   :  { %v542_v5 = vsel %vm150_vm2, %v540_v4, 0.0 }
 0x624   :  { %543 = vadd.xlane.f32.xlu1 %v542_v5 }
 0x628   :  { %546 = vadd.xlane.f32.xlu1 %v545_v7  ;;  %v969_v7 = vld [vmem:[%s1370_s1 + $0xce] ss:$0 sm:$0xff] }
 0x6ad   :  { %v544_v16 = vpop.xlane.xlu1 %543 }
 0x6ae   :  { %v548_v17 = vmul.f32 0.03125, %v544_v16  ;;  %v33_v16 = vld [vmem:[%s1370_s1 + $0x90] sm:$0xff] }
 0x6b0   :  { %v550_v18 = vadd.f32 1e-05, %v548_v17  ;;  %v37_v17 = vld [vmem:[%s1370_s1 + $0xb0] sm:$0xff] }
 0x6b1   :  { %v547_v20 = vpop.xlane.xlu1 %546 }
 0x6b2   :  { %1134 = vrsqrt.f32 %v550_v18  ;;  %v549_v21 = vmul.f32 0.03125, %v547_v20  ;;  %v36_v18 = vld [vmem:[%s1370_s1 + $0xa8] sm:$0xff]  ;;  %v35_v20 = vld [vmem:[%s1370_s1 + $0xa0] sm:$0xff] }
 0x6b4   :  { %v551_v22 = vadd.f32 1e-05, %v549_v21  ;;  %v34_v21 = vld [vmem:[%s1370_s1 + $0x98] sm:$0xff] }
 0x6b6   :  { %1136 = vrsqrt.f32 %v551_v22  ;;  %v950_v22 = vld [vmem:[%s1370_s1 + $0xc9] ss:$0 sm:$0xff] }
 0x6bf   :  { %v1135_v23 = vpop.eup %1134 }
 0x6c0   :  { %v554_v25 = vmul.f32 %v1135_v23, %v538_v3  ;;  %v149_v23 = vadd.f32 %v950_v22, %v1243_v19 }
 0x6c2   :  { %v560_v27 = vmul.f32 %v961_v24, %v554_v25 }
 0x6c3   :  { %v1137_v28 = vpop.eup %1136 }
 0x6c4   :  { %v555_v29 = vmul.f32 %v1137_v28, %v539_v2  ;;  %v566_v30 = vadd.f32 %v962_v26, %v560_v27 }
 0x6c6   :  { %v561_v31 = vmul.f32 %v961_v24, %v555_v29  ;;  %1080 = vmatprep.mubr.msk.f32.mxu0 %vm150_vm2, %v566_v30 }
 0x6c8   :  { %v567_v32 = vadd.f32 %v962_v26, %v561_v31 }
 0x6ca   :  { %1081 = vmatmul.mubr.msk.f32.vlgmr.msra.gmra.mxu0 %vm150_vm2, %v567_v32 }
 0x6cb   :  { %1106 = vmatprep.mubr.msk.f32.mxu0 %vm1165_vm0, %v1164_v1 }
 0x78a   :  { %v1082_v38 = vpop.f32.mrf.mxu0 }
 0x78b   :  { %v650_v39 = vadd.f32 %v1082_v38, %v963_v37 }
 0x78c   :  { %v644_v40 = vpop.f32.mrf.mxu0 }
 0x78d   :  { %v645_v41 = vadd.f32 %v963_v37, %v644_v40  ;;  %v654_v43 = vmax.f32 %v650_v39, 0.0 }
 0x78f   :  { %v653_v42 = vmax.f32 %v645_v41, 0.0 }
 0x791   :  { %1099 = vmatprep.mubr.msk.f32.mxu1 %vm659_vm3, %v653_v42 }
 0x792   :  { %1100 = vmatmul.mubr.msk.f32.vlgmr.msra.gmra.mxu1 %vm659_vm3, %v654_v43 }
 0x852   :  { %v1101_v45 = vpop.f32.mrf.mxu1 }
 0x853   :  { %v738_v46 = vadd.f32 %v1101_v45, %v966_v44 }
 0x854   :  { %v732_v47 = vpop.f32.mrf.mxu1 }
 0x855   :  { %v733_v48 = vadd.f32 %v966_v44, %v732_v47  ;;  %v742_v49 = vadd.f32 %v738_v46, %v567_v32 }
 0x857   :  { %v746_v50 = vsel %vm150_vm2, %v742_v49, 0.0  ;;  %v741_v51 = vadd.f32 %v733_v48, %v566_v30 }
 0x858   :  { %747 = vadd.xlane.f32.xlu1 %v746_v50 }
 0x859   :  { %v743_v52 = vsel %vm150_vm2, %v741_v51, 0.0 }
 0x85a   :  { %744 = vadd.xlane.f32.xlu0 %v743_v52 }
 0x8e1   :  { %v748_v53 = vpop.xlane.xlu1 %747 }
 0x8e2   :  { %v750_v54 = vmul.f32 0.03125, %v748_v53 }
 0x8e3   :  { %v745_v55 = vpop.xlane.xlu0 %744 }
 0x8e4   :  { %v752_v56 = vsub.f32 %v742_v49, %v750_v54  ;;  %v749_v57 = vmul.f32 0.03125, %v745_v55 }
 0x8e6   :  { %v751_v58 = vsub.f32 %v741_v51, %v749_v57  ;;  %v754_v59 = vmul.f32 %v752_v56, %v752_v56 }
 0x8e8   :  { %v758_v60 = vsel %vm150_vm2, %v754_v59, 0.0  ;;  %v753_v61 = vmul.f32 %v751_v58, %v751_v58 }
 0x8e9   :  { %759 = vadd.xlane.f32.xlu1 %v758_v60 }
 0x8ea   :  { %v755_v62 = vsel %vm150_vm2, %v753_v61, 0.0 }
 0x8eb   :  { %756 = vadd.xlane.f32.xlu0 %v755_v62 }
 0x972   :  { %v760_v63 = vpop.xlane.xlu1 %759 }
 0x973   :  { %v762_v0 = vmul.f32 0.03125, %v760_v63 }
 0x974   :  { %v757_v2 = vpop.xlane.xlu0 %756 }
 0x975   :  { %v764_v3 = vadd.f32 1e-05, %v762_v0  ;;  %v761_v4 = vmul.f32 0.03125, %v757_v2 }
 0x977   :  { %1138 = vrsqrt.f32 %v764_v3  ;;  %v763_v5 = vadd.f32 1e-05, %v761_v4 }
 0x979   :  { %1140 = vrsqrt.f32 %v763_v5 }
 0x984   :  { %v1139_v6 = vpop.eup %1138 }
 0x985   :  { %v768_v8 = vmul.f32 %v1139_v6, %v752_v56 }
 0x986   :  { %v1141_v9 = vpop.eup %1140 }
 0x987   :  { %v774_v11 = vmul.f32 %v969_v7, %v768_v8  ;;  %v767_v12 = vmul.f32 %v1141_v9, %v751_v58 }
 0x989   :  { %v780_v13 = vadd.f32 %v970_v10, %v774_v11  ;;  %v773_v14 = vmul.f32 %v969_v7, %v767_v12 }
 0x98b   :  { %1103 = vmatpush3.msra.mxu0 %v780_v13  ;;  %v779_v15 = vadd.f32 %v970_v10, %v773_v14 }
 0x98c   :  { %1104 = vmatprep.subr.mxu0 %v1164_v1 }
 0x98d   :  { %1105 = vmatpush3.msra.mxu0 %v779_v15 }
 0x98e   :  { %1107 = vmatmul.mubr.msk.f32.vlgmr.msra.gmra.mxu0 %vm49_vm1, %v33_v16  ;;  %1109 = vmatprep.subr.mxu0 %v1164_v1 }
 0x98f   :  { %1110 = vmatpush3.msra.mxu0 %v37_v17  ;;  %1117 = vmatprep.mubr.msk.f32.mxu0 %vm1165_vm0, %v1164_v1 }
 0x990   :  { %1111 = vmatprep.subr.mxu0 %v1164_v1 }
 0x991   :  { %1112 = vmatpush3.msra.mxu0 %v36_v18 }
 0x992   :  { %1113 = vmatprep.subr.mxu0 %v1164_v1 }
 0x993   :  { %1114 = vmatpush3.msra.mxu0 %v35_v20 }
 0x994   :  { %1115 = vmatprep.subr.mxu0 %v1164_v1  ;;  %v972_v1 = vld [vmem:[%s1370_s1 + $0xd0] ss:$0 sm:$0xff] }
 0x995   :  { %1116 = vmatpush3.msra.mxu0 %v34_v21 }
 0xa4e   :  { %v850_v24 = vpop.f32.mrf.mxu0 }
 0xa4f   :  { %v851_v25 = vadd.f32 %v850_v24, %v149_v23 }
 0xa50   :  { %v1108_v26 = vpop.f32.mrf.mxu0 }
 0xa51   :  { %1118 = vmatmul.mubr.msk.f32.vlgmr.msra.gmra.mxu0 %vm150_vm2, %v851_v25 }
 0xb11   :  { %v927_v27 = vpop.f32.mrf.mxu0 }
 0xb12   :  { %v928_v28 = vadd.f32 %v972_v1, %v927_v27 }
 0xb13   :  { %v1119_v29 = vpop.f32.mrf.mxu0 }
 0xb14   :  { %931 = vst [vmem:[#allocation2] sm:$0xff] %v928_v28 }
 0xb15   :  { %1153 = shalt.err (!%p1150_p4)
}
 0xb16   :  { %941 = dma.vmem_to_hbm [thread:$0]  %s939_s29, 128, %s1371_s2, [#allocation3]  }
 0xb17   :  { %1162 = dma.done.wait [#allocation3], 128  }
 0xb18   :  { %1163 = vsyncadd [#allocation3], 4294967168 }
 0xb19   :  { %945 = vsyncpa [#allocation3], 1 }

</bundles_post_ra>
